<compile_context>
chip_gen: v5e
topology: v5e:2x2
jax: 0.10.0
libtpu: 0.0.40
codegen_flags: <defaults>
</compile_context>

<pallas_src>
import functools

import jax
import jax.numpy as jnp
from jax.experimental import pallas as pl
from jax.experimental.pallas import tpu as pltpu

HIDDEN = 64            # fixed by the PyTorch module (nn.Linear(state_dim, 64))
FUSED_H = 2 * HIDDEN   # 128: policy hidden | value hidden -> one vreg lane width


def _round_up(n, m):
    return ((n + m - 1) // m) * m


def _ppo_fused_kernel(x_ref, w1_ref, b1_ref, w2_ref, b2_ref, logits_ref, value_ref):
    """One batch tile:
         h   = relu(x @ W1cat + b1cat)                (f32 epilogue)
         out = h @ W2block + b2                        (f32 accumulate)
         logits = out[:, :A], value = out[:, A:A+1]    (narrow direct stores)
    """
    act = logits_ref.shape[-1]
    # bf16 MXU inputs (f32 accumulate); the cast is a VMEM-local pack, not HBM traffic.
    x = x_ref[...].astype(jnp.bfloat16)
    h = jnp.dot(x, w1_ref[...], preferred_element_type=jnp.float32) + b1_ref[...]
    h = jnp.maximum(h, 0.0)  # ReLU in f32 (v5e VPU has no bf16 VALU)
    out = jnp.dot(h.astype(jnp.bfloat16), w2_ref[...],
                  preferred_element_type=jnp.float32) + b2_ref[...]
    logits_ref[...] = out[:, :act].astype(logits_ref.dtype)
    value_ref[...] = out[:, act:act + 1].astype(value_ref.dtype)


@functools.partial(jax.jit, static_argnames=("action_dim",))
def ppo_forward(x, fused, *, action_dim):
    """Pallas-backed forward pass equivalent to PPOAgent.forward.

    Args:
      x: [B, state_dim] float32 (or bf16 — accepted directly, halves the read stream)
      fused: dict with fused weights (see fuse_params)
      action_dim: number of policy actions (static)
    Returns:
      (logits [B, action_dim], value [B, 1]) — both float32.
    """
    B, K = x.shape
    out_w = fused["w2"].shape[-1]
    assert out_w >= action_dim + 1, "fused layer-2 weight too narrow for action_dim"
    assert fused["w1"].shape == (K, FUSED_H), "fused layer-1 weight / state_dim mismatch"

    # >=2 grid steps when B >= 16 (v7x megacore sharding), 1024-row tiles for big B.
    block_b = min(1024, _round_up(max(-(-B // 2), 8), 8))
    grid = (pl.cdiv(B, block_b),)

    # Advisory cost hint so XLA schedules this micro-kernel against surrounding ops.
    flops = 2 * B * K * FUSED_H + 2 * B * FUSED_H * out_w
    bytes_accessed = (int(x.dtype.itemsize) * B * K            # x read
                      + 2 * (K * FUSED_H + FUSED_H * out_w)    # bf16 weights
                      + 4 * (FUSED_H + out_w)                  # f32 biases
                      + 4 * B * (action_dim + 1))              # narrow outputs

    logits, value = pl.pallas_call(
        _ppo_fused_kernel,
        out_shape=(jax.ShapeDtypeStruct((B, action_dim), jnp.float32),
                   jax.ShapeDtypeStruct((B, 1), jnp.float32)),
        grid=grid,
        in_specs=[
            pl.BlockSpec((block_b, K), lambda i: (i, 0)),       # x tile (pipelined)
            pl.BlockSpec((K, FUSED_H), lambda i: (0, 0)),       # W1cat (VMEM-resident)
            pl.BlockSpec((1, FUSED_H), lambda i: (0, 0)),       # b1cat
            pl.BlockSpec((FUSED_H, out_w), lambda i: (0, 0)),   # W2 block layout
            pl.BlockSpec((1, out_w), lambda i: (0, 0)),         # b2
        ],
        out_specs=(pl.BlockSpec((block_b, action_dim), lambda i: (i, 0)),
                   pl.BlockSpec((block_b, 1), lambda i: (i, 0))),
        compiler_params=pltpu.CompilerParams(
            dimension_semantics=("parallel",),
        ),
        cost_estimate=pl.CostEstimate(
            flops=flops, transcendentals=0, bytes_accessed=bytes_accessed),
    )(x, fused["w1"], fused["b1"], fused["w2"], fused["b2"])
    return logits, value


def init_params(key, state_dim, action_dim=3, hidden=HIDDEN):
    """Deterministic init mimicking nn.Linear's uniform(-1/sqrt(fan_in), 1/sqrt(fan_in)).

    Weights stored [in_features, out_features] (pre-transposed vs PyTorch),
    biases as [1, out_features].  Kept in f32; fuse_params casts for the kernel.
    """
    keys = jax.random.split(key, 8)

    def lin(kw, kb, fan_in, fan_out):
        bound = 1.0 / jnp.sqrt(jnp.float32(fan_in))
        w = jax.random.uniform(kw, (fan_in, fan_out), jnp.float32, -bound, bound)
        b = jax.random.uniform(kb, (1, fan_out), jnp.float32, -bound, bound)
        return w, b

    pw1, pb1 = lin(keys[0], keys[1], state_dim, hidden)
    pw2, pb2 = lin(keys[2], keys[3], hidden, action_dim)
    vw1, vb1 = lin(keys[4], keys[5], state_dim, hidden)
    vw2, vb2 = lin(keys[6], keys[7], hidden, 1)
    return dict(pw1=pw1, pb1=pb1, pw2=pw2, pb2=pb2,
                vw1=vw1, vb1=vb1, vw2=vw2, vb2=vb2)


def fuse_params(p, action_dim):
    """Build the fused parameter layout used by the kernel (bf16 weights, f32 biases)."""
    assert p["pw1"].shape[1] == HIDDEN and p["vw1"].shape[1] == HIDDEN
    assert p["pw2"].shape == (HIDDEN, action_dim), "pw2 shape / action_dim mismatch"
    assert p["vw2"].shape == (HIDDEN, 1)
    out_w = _round_up(action_dim + 1, 8)  # logits cols [0:A], value col at A, zero-pad

    # Layer 1: [K, 64] | [K, 64]  ->  [K, 128]  (one lane-filling MXU matmul)
    w1 = jnp.concatenate([p["pw1"], p["vw1"]], axis=1).astype(jnp.bfloat16)
    b1 = jnp.concatenate([p["pb1"], p["vb1"]], axis=1).astype(jnp.float32)

    # Layer 2: block layout, padded to out_w lanes.
    #   rows 0:64   (policy hidden) -> cols [0:action_dim]  = pw2
    #   rows 64:128 (value hidden)  -> col  [action_dim]    = vw2
    w2 = jnp.zeros((FUSED_H, out_w), jnp.float32)
    w2 = w2.at[:HIDDEN, :action_dim].set(p["pw2"])
    w2 = w2.at[HIDDEN:, action_dim:action_dim + 1].set(p["vw2"])
    b2 = jnp.zeros((1, out_w), jnp.float32)
    b2 = b2.at[:, :action_dim].set(p["pb2"])
    b2 = b2.at[:, action_dim:action_dim + 1].set(p["vb2"])
    return dict(w1=w1, b1=b1, w2=w2.astype(jnp.bfloat16), b2=b2)


def _reference_forward(x, p):
    """Pure-JAX f32 reference matching PPOAgent.forward (unfused)."""
    h_p = jnp.maximum(x @ p["pw1"] + p["pb1"], 0.0)
    logits = h_p @ p["pw2"] + p["pb2"]
    h_v = jnp.maximum(x @ p["vw1"] + p["vb1"], 0.0)
    value = h_v @ p["vw2"] + p["vb2"]
    return logits, value


if __name__ == "__main__":
    STATE_DIM, ACTION_DIM = 32, 3

    key = jax.random.PRNGKey(0)
    k_params, k_x1, k_x2 = jax.random.split(key, 3)

    params = init_params(k_params, STATE_DIM, ACTION_DIM)
    fused = fuse_params(params, ACTION_DIM)

    # B=8: aligned batch.  B=13: exercises the cdiv grid + ragged last block
    # (no pre-pad pass, exact out_shape, no out[:B] trim).
    for B, kx in ((8, k_x1), (13, k_x2)):
        x = jax.random.normal(kx, (B, STATE_DIM), jnp.float32)
        logits, value = ppo_forward(x, fused, action_dim=ACTION_DIM)
        jax.block_until_ready((logits, value))

        ref_logits, ref_value = _reference_forward(x, params)
        assert logits.shape == (B, ACTION_DIM) and value.shape == (B, 1)
        # bf16 MXU inputs (f32 accumulate) vs f32 reference -> relaxed tolerance.
        assert jnp.allclose(logits, ref_logits, atol=2e-2, rtol=2e-2)
        assert jnp.allclose(value, ref_value, atol=2e-2, rtol=2e-2)

    # TODO(synk): select_action's softmax + multinomial sampling could be fused
    # in-kernel (Gumbel-max via pltpu.prng_seed/prng_random_bits) but is kept
    # outside to preserve forward()'s (logits, value) contract; the no-op
    # compute_loss/train_step/Adam are host-side control logic, not kernel work.
    print("KERNEL_OK")
</pallas_src>

<mosaic_0001>
module attributes {stable_mosaic.version = 11 : i64} {
  func.func @_ppo_fused_kernel(%arg0: i32, %arg1: memref<8x32xf32, #tpu.memory_space<vmem>>, %arg2: memref<32x128xbf16, #tpu.memory_space<vmem>>, %arg3: memref<1x128xf32, #tpu.memory_space<vmem>>, %arg4: memref<128x8xbf16, #tpu.memory_space<vmem>>, %arg5: memref<1x8xf32, #tpu.memory_space<vmem>>, %arg6: memref<8x3xf32, #tpu.memory_space<vmem>>, %arg7: memref<8x1xf32, #tpu.memory_space<vmem>>) attributes {dimension_semantics = [#tpu.dimension_semantics<parallel>], iteration_bounds = array<i64: 1>, scalar_prefetch = 0 : i64, scratch_operands = 0 : i64, tpu.core_type = #tpu.core_type<tc>, window_params = [{transform_indices = @transform_0, window_bounds = array<i64: 8, 32>}, {pipeline_mode = #tpu.pipeline_mode<synchronous>, transform_indices = @transform_1, window_bounds = array<i64: 32, 128>}, {pipeline_mode = #tpu.pipeline_mode<synchronous>, transform_indices = @transform_2, window_bounds = array<i64: 1, 128>}, {pipeline_mode = #tpu.pipeline_mode<synchronous>, transform_indices = @transform_3, window_bounds = array<i64: 128, 8>}, {pipeline_mode = #tpu.pipeline_mode<synchronous>, transform_indices = @transform_4, window_bounds = array<i64: 1, 8>}, {transform_indices = @transform_5, window_bounds = array<i64: 8, 3>}, {transform_indices = @transform_6, window_bounds = array<i64: 8, 1>}]} {
    %c0 = arith.constant 0 : index
    %c0_0 = arith.constant 0 : index
    %0 = vector.load %arg1[%c0, %c0_0] : memref<8x32xf32, #tpu.memory_space<vmem>>, vector<8x32xf32>
    %1 = arith.truncf %0 : vector<8x32xf32> to vector<8x32xbf16>
    %c0_1 = arith.constant 0 : index
    %c0_2 = arith.constant 0 : index
    %2 = vector.load %arg2[%c0_1, %c0_2] : memref<32x128xbf16, #tpu.memory_space<vmem>>, vector<32x128xbf16>
    %cst = arith.constant dense<0.000000e+00> : vector<8x128xf32>
    %3 = tpu.matmul %1, %2, %cst {dimension_numbers = #tpu.dot_dimension_numbers<[1], [0], [0], [1], [0, 0, 1, 1], [], []>} : vector<8x32xbf16>, vector<32x128xbf16>, vector<8x128xf32> -> vector<8x128xf32>
    %c0_3 = arith.constant 0 : index
    %c0_4 = arith.constant 0 : index
    %4 = vector.load %arg3[%c0_3, %c0_4] : memref<1x128xf32, #tpu.memory_space<vmem>>, vector<1x128xf32>
    %5 = vector.broadcast %4 : vector<1x128xf32> to vector<8x128xf32>
    %6 = arith.addf %3, %5 : vector<8x128xf32>
    %cst_5 = arith.constant 0.000000e+00 : f32
    %7 = vector.broadcast %cst_5 : f32 to vector<8x128xf32>
    %8 = arith.maximumf %6, %7 : vector<8x128xf32>
    %9 = arith.truncf %8 : vector<8x128xf32> to vector<8x128xbf16>
    %c0_6 = arith.constant 0 : index
    %c0_7 = arith.constant 0 : index
    %10 = vector.load %arg4[%c0_6, %c0_7] : memref<128x8xbf16, #tpu.memory_space<vmem>>, vector<128x8xbf16>
    %cst_8 = arith.constant dense<0.000000e+00> : vector<8x8xf32>
    %11 = tpu.matmul %9, %10, %cst_8 {dimension_numbers = #tpu.dot_dimension_numbers<[1], [0], [0], [1], [0, 0, 1, 1], [], []>} : vector<8x128xbf16>, vector<128x8xbf16>, vector<8x8xf32> -> vector<8x8xf32>
    %c0_9 = arith.constant 0 : index
    %c0_10 = arith.constant 0 : index
    %12 = vector.load %arg5[%c0_9, %c0_10] : memref<1x8xf32, #tpu.memory_space<vmem>>, vector<1x8xf32>
    %13 = vector.broadcast %12 : vector<1x8xf32> to vector<8x8xf32>
    %14 = arith.addf %11, %13 : vector<8x8xf32>
    %15 = vector.extract_strided_slice %14 {offsets = [0, 0], sizes = [8, 3], strides = [1, 1]} : vector<8x8xf32> to vector<8x3xf32>
    %c0_11 = arith.constant 0 : index
    %c0_12 = arith.constant 0 : index
    %16 = vector.load %arg6[%c0_11, %c0_12] : memref<8x3xf32, #tpu.memory_space<vmem>>, vector<8x3xf32>
    tpu.vector_store %arg6[%c0_11, %c0_12], %15 {strides = array<i32>} : memref<8x3xf32, #tpu.memory_space<vmem>>, vector<8x3xf32>,
    %17 = vector.extract_strided_slice %14 {offsets = [0, 3], sizes = [8, 1], strides = [1, 1]} : vector<8x8xf32> to vector<8x1xf32>
    %c0_13 = arith.constant 0 : index
    %c0_14 = arith.constant 0 : index
    %18 = vector.load %arg7[%c0_13, %c0_14] : memref<8x1xf32, #tpu.memory_space<vmem>>, vector<8x1xf32>
    tpu.vector_store %arg7[%c0_13, %c0_14], %17 {strides = array<i32>} : memref<8x1xf32, #tpu.memory_space<vmem>>, vector<8x1xf32>,
    return
  }
  func.func @transform_0(%arg0: i32) -> (i32, i32) {
    %c0_i32 = arith.constant 0 : i32
    %c0_i32_0 = arith.constant 0 : i32
    return %arg0, %c0_i32 : i32, i32
  }
  func.func @transform_1(%arg0: i32) -> (i32, i32) {
    %c0_i32 = arith.constant 0 : i32
    %c0_i32_0 = arith.constant 0 : i32
    %c0_i32_1 = arith.constant 0 : i32
    return %c0_i32, %c0_i32_0 : i32, i32
  }
  func.func @transform_2(%arg0: i32) -> (i32, i32) {
    %c0_i32 = arith.constant 0 : i32
    %c0_i32_0 = arith.constant 0 : i32
    %c0_i32_1 = arith.constant 0 : i32
    return %c0_i32, %c0_i32_0 : i32, i32
  }
  func.func @transform_3(%arg0: i32) -> (i32, i32) {
    %c0_i32 = arith.constant 0 : i32
    %c0_i32_0 = arith.constant 0 : i32
    %c0_i32_1 = arith.constant 0 : i32
    return %c0_i32, %c0_i32_0 : i32, i32
  }
  func.func @transform_4(%arg0: i32) -> (i32, i32) {
    %c0_i32 = arith.constant 0 : i32
    %c0_i32_0 = arith.constant 0 : i32
    %c0_i32_1 = arith.constant 0 : i32
    return %c0_i32, %c0_i32_0 : i32, i32
  }
  func.func @transform_5(%arg0: i32) -> (i32, i32) {
    %c0_i32 = arith.constant 0 : i32
    %c0_i32_0 = arith.constant 0 : i32
    return %arg0, %c0_i32 : i32, i32
  }
  func.func @transform_6(%arg0: i32) -> (i32, i32) {
    %c0_i32 = arith.constant 0 : i32
    %c0_i32_0 = arith.constant 0 : i32
    return %arg0, %c0_i32 : i32, i32
  }
}

</mosaic_0001>

<bundles_post_ra>
// kernel: ppo_forward.1
= control target key start
LH: loop header
LB: loop body
LE: loop exit
PB: predicated region body
PF: predicated region fallthrough
CT: control target
= control target key end

     0   :  { %vm45_vm0 = vcmask 261120   ;;  %vm145_vm1 = vcmask 23552   ;;  %s215_s22 = smov 125   ;;  %vm151_vm2 = vcmask 7168   ;;  %s296_s1 = inlined_call_operand.vmem [shape: bf16[32,128], index: 1, kind: input, shape index: {}]   ;;  %s297_s0 = inlined_call_operand.vmem [shape: f32[8,32], index: 0, kind: input, shape index: {}]   ;;  %s298_s3 = inlined_call_operand.vmem [shape: bf16[128,8], index: 3, kind: input, shape index: {}]   ;;  %s299_s2 = inlined_call_operand.vmem [shape: f32[1,128], index: 2, kind: input, shape index: {}]   ;;  %s300_s4 = inlined_call_operand.vmem [shape: f32[1,8], index: 4, kind: input, shape index: {}]   ;;  %s301_s5 = inlined_call_operand.vmem [shape: f32[8,3], index: 5, kind: output, shape index: {0}]   ;;  %s302_s6 = inlined_call_operand.vmem [shape: f32[8,1], index: 6, kind: output, shape index: {1}]  }
   0x1   :  { %v203_v0 = vld [vmem:[%s296_s1 + $0x8] sm:$0xff]  ;;  %v211_v1 = vld [vmem:[%s298_s3 + $0x38] sm:$0xff]  ;;  %v202_v2 = vld [vmem:[%s296_s1] sm:$0xff] }
   0x2   :  { %55 = vmatpush.bf16.msra.mxu0 %v203_v0  ;;  %v23_v3 = vld [vmem:[%s297_s0] sm:$0xff]  ;;  %132 = vmatpush.bf16.msra.mxu1 %v211_v1  ;;  %v210_v4 = vld [vmem:[%s298_s3 + $0x30] sm:$0xff]  ;;  %v209_v6 = vld [vmem:[%s298_s3 + $0x28] sm:$0xff] }
   0x3   :  { %v24_v5 = vpack.c.bf16 %v23_v3, %v23_v3  ;;  %v208_v7 = vld [vmem:[%s298_s3 + $0x20] sm:$0xff]  ;;  %v207_v8 = vld [vmem:[%s298_s3 + $0x18] sm:$0xff]  ;;  %v206_v9 = vld [vmem:[%s298_s3 + $0x10] sm:$0xff] }
   0x4   :  { %v205_v10 = vld [vmem:[%s298_s3 + $0x8] sm:$0xff]  ;;  %v204_v11 = vld [vmem:[%s298_s3] sm:$0xff] }
   0x5   :  { %v213_v12 = vld [vmem:[%s299_s2] ss:$0 sm:$0xff] }
   0x6   :  { %56 = vmatpush.bf16.msra.mxu0 %v202_v2  ;;  %133 = vmatpush.bf16.msra.mxu1 %v210_v4  ;;  %v214_v18 = vld [vmem:[%s300_s4] ss:$0 sm:$0xff] }
   0x9   :  { %169 = vmatmul.msk.bf16.vlgmr.msra.gmra.mxu0 %vm45_vm0, %v24_v5 }
   0xa   :  { %134 = vmatpush.bf16.msra.mxu1 %v209_v6 }
   0xe   :  { %135 = vmatpush.bf16.msra.mxu1 %v208_v7 }
  0x12   :  { %136 = vmatpush.bf16.msra.mxu1 %v207_v8 }
  0x16   :  { %137 = vmatpush.bf16.msra.mxu1 %v206_v9 }
  0x1a   :  { %138 = vmatpush.bf16.msra.mxu1 %v205_v10 }
  0x1e   :  { %139 = vmatpush.bf16.msra.mxu1 %v204_v11 }
  0x86   :  { %v58_v13 = vpop.f32.mrf.mxu0 }
  0x87   :  { %v59_v14 = vadd.f32 %v213_v12, %v58_v13 }
  0x89   :  { %v62_v15 = vmax.f32 %v59_v14, 0.0 }
  0x8b   :  { %v63_v16 = vpack.c.bf16 %v62_v15, %v62_v15 }
  0x8d   :  { %140 = vmatmul.bf16.vlgmr.msra.gmra.mxu1 %v63_v16 }
  0x8e   :  { %v60_v17 = vpop.f32.mrf.mxu0 }
 0x10a   :  { %v141_v19 = vpop.f32.mrf.mxu1 }
 0x10b   :  { %v142_v20 = vadd.f32 %v214_v18, %v141_v19 }
 0x10d   :  { %146 = vst.msk [vmem:[%s301_s5] sm:$0xff] %vm145_vm1, %v142_v20  ;;  %148 = vrot.lane.b32.xlu0 %v142_v20, %s215_s22 }
 0x112   :  { %v143_v21 = vpop.f32.mrf.mxu1 }
 0x17f   :  { %v149_v22 = vpop.permute.xlu0 %148 }
 0x180   :  { %152 = vst.msk [vmem:[%s302_s6] sm:$0xff] %vm151_vm2, %v149_v22 }

</bundles_post_ra>
